<compile_context>
chip_gen: v7x
topology: tpu7x:2x2x1
jax: 0.10.0
libtpu: 0.0.40
codegen_flags: <defaults>
</compile_context>

<pallas_src>
import functools

import numpy as np
import jax
import jax.numpy as jnp
from jax import lax
from jax.experimental import pallas as pl
from jax.experimental.pallas import tpu as pltpu


MAX_TILE_ROWS = 1024          # measured sweet spot ~512-1024 rows per tile
_SINGLE_BUFFER_WEIGHTS = True  # flipped off at runtime if pl.Buffered(1) is rejected


def _upsample1d_kernel(x_ref, halo_ref, w_ref, b_ref, o_ref, *, split):
    # x_ref:    (1, TL, C)
    # halo_ref: (1, 1, 2, C)   row 0 = x[tile_start-1], row 1 = x[tile_end]  (zeros at global edges)
    # w_ref:    (3C, 2C) fused packed   OR   (4, C, C) per-tap (split path)
    # b_ref:    (1, 2C) float32
    # o_ref:    (1, TL, 2C)
    x = x_ref[0]                                   # (TL, C)
    TL, C = x.shape
    halo = halo_ref[0, 0]                          # (2, C)
    prev_row = halo[0:1, :]                        # (1, C)
    next_row = halo[1:2, :]                        # (1, C)

    # Narrow (TL, 1) iota for boundary masks (broadcast over lanes).
    # pltpu.roll needs non-negative shifts, so shift-by-(-1) is TL - 1.
    row = lax.broadcasted_iota(jnp.int32, (TL, 1), 0)
    x_prev = jnp.where(row == 0, prev_row, pltpu.roll(x, shift=1, axis=0))        # x[m-1]
    x_next = jnp.where(row == TL - 1, next_row, pltpu.roll(x, shift=TL - 1, axis=0))  # x[m+1]

    if split:
        # Zero-free MXU path (C % 128 == 0): four (TL,C)@(C,C) matmuls, no input concat.
        w0, w1, w2, w3 = w_ref[0], w_ref[1], w_ref[2], w_ref[3]
        even = (jnp.dot(x, w1, preferred_element_type=jnp.float32)
                + jnp.dot(x_prev, w3, preferred_element_type=jnp.float32))
        odd = (jnp.dot(x, w2, preferred_element_type=jnp.float32)
               + jnp.dot(x_next, w0, preferred_element_type=jnp.float32))
        acc = jnp.concatenate([even, odd], axis=-1)            # lane-aligned, cheap
    else:
        # Fused path (small C): one matmul against the zero-padded packed weight.
        xcat = jnp.concatenate([x, x_prev, x_next], axis=-1)    # (TL, 3C)
        acc = jnp.dot(xcat, w_ref[...], preferred_element_type=jnp.float32)

    out = acc + b_ref[...]                                      # (1, 2C) broadcast, f32
    o_ref[0] = out.astype(o_ref.dtype)                          # single lane-dense store


def _vmem_budget_bytes():
    """Per-generation VMEM budget, leaving headroom for Mosaic internal scratch."""
    cap = 64 * 1024 * 1024          # safe default (v7x-sized) if the query fails
    try:
        info = pltpu.get_tpu_info()
        cap = int(getattr(info, "vmem_capacity_bytes", cap))
    except Exception:
        pass
    # 64 MiB chips -> ~52 MiB budget; 128 MiB chips -> ~112 MiB budget.
    return cap - max(cap // 8, 12 * 1024 * 1024)


def _pack_params(weight, bias, compute_dtype, split):
    """weight: (C_in, C_out, 4), bias: (C_out,).

    split=True  -> (4, C, C) per-tap weights (zero-free matmuls).
    split=False -> (3C, 2C) packed [ [w1,w2], [w3,0], [0,w0] ] for one fused matmul.
    Bias is always (1, 2C) float32 (added post-accumulation).
    """
    C = weight.shape[0]
    w = weight.astype(compute_dtype)
    if split:
        w_packed = jnp.transpose(w, (2, 0, 1))                     # (4, C, C)
    else:
        w0, w1, w2, w3 = w[:, :, 0], w[:, :, 1], w[:, :, 2], w[:, :, 3]
        z = jnp.zeros((C, C), w.dtype)
        w_even = jnp.concatenate([w1, w3, z], axis=0)              # (3C, C)
        w_odd = jnp.concatenate([w2, z, w0], axis=0)               # (3C, C)
        w_packed = jnp.concatenate([w_even, w_odd], axis=1)        # (3C, 2C)
    b_packed = jnp.concatenate([bias, bias]).reshape(1, 2 * C).astype(jnp.float32)
    return w_packed, b_packed


def upsample1d_blc(x_blc, weight, bias, *, compute_dtype=None, out_dtype=None,
                   max_rows_per_tile=None):
    """Channels-last entry point (avoids NCW<->NLC HBM transposes).

    x_blc: (B, L, C).  weight: (C_in, C_out, 4) PyTorch layout.  bias: (C_out,).
    Returns (B, 2*L, C) in `out_dtype` (default: x dtype).
    compute_dtype=jnp.bfloat16 halves x/W read bytes (f32 accumulation kept);
    out_dtype=jnp.bfloat16 also halves write bytes — recommended on v5e when
    the surrounding model tolerates it.
    """
    global _SINGLE_BUFFER_WEIGHTS

    B, L, C = x_blc.shape
    if out_dtype is None:
        out_dtype = x_blc.dtype
    cdt = x_blc.dtype if compute_dtype is None else jnp.dtype(compute_dtype)
    x_blc = x_blc.astype(cdt)

    split = (C % 128 == 0)          # zero-free MXU path only when lanes are aligned
    w_packed, b_packed = _pack_params(weight, bias, cdt, split)

    in_bytes = jnp.dtype(cdt).itemsize
    out_bytes = jnp.dtype(out_dtype).itemsize
    w_bytes = int(np.prod(w_packed.shape)) * in_bytes
    b_bytes = 2 * C * 4
    halo_bytes = 2 * (2 * C * in_bytes)

    budget = _vmem_budget_bytes()
    # Tightened estimate: double-buffered x / out rows + (conservatively double-
    # buffered) constants + slack for Mosaic internals.
    fixed = 2 * w_bytes + 2 * b_bytes + halo_bytes + (2 << 20)
    per_row = 2 * C * in_bytes + 2 * (2 * C) * out_bytes

    if max_rows_per_tile is not None:
        TL = int(max_rows_per_tile)
    else:
        TL = int(min(max((budget - fixed) // per_row, 8), MAX_TILE_ROWS))
    if TL >= L:
        TL = L                      # single tile along L (any L allowed)
    else:
        TL = max(8, (TL // 8) * 8)  # keep the sublane dim 8-aligned when tiling

    nL = (L + TL - 1) // TL
    Lp = nL * TL
    if Lp != L:
        # Zero-pad L up to a tile multiple; padded rows are zeros so x[L] = 0
        # stays correct, and the padded outputs are sliced off below.
        x_blc = jnp.pad(x_blc, ((0, 0), (0, Lp - L), (0, 0)))

    # Halo rows: for tile l, row 0 = x[l*TL - 1] (0 at the left edge) and
    # row 1 = x[(l+1)*TL] (0 at the right edge).  Tiny side input -> both grid
    # axes stay "parallel"; interior tile edges are sourced correctly.
    last_rows = x_blc[:, TL - 1::TL, :]                         # (B, nL, C)
    first_rows = x_blc[:, ::TL, :]                              # (B, nL, C)
    zero_row = jnp.zeros((B, 1, C), x_blc.dtype)
    halo_prev = jnp.concatenate([zero_row, last_rows[:, :-1, :]], axis=1)
    halo_next = jnp.concatenate([first_rows[:, 1:, :], zero_row], axis=1)
    halo = jnp.stack([halo_prev, halo_next], axis=2)            # (B, nL, 2, C)

    need = fixed + TL * per_row
    vmem_limit = int(min(max(need + (4 << 20), 32 << 20), budget))

    def run(single_buffer_weights):
        const_kwargs = {}
        if single_buffer_weights:
            # Constant index_map -> one DMA, one resident buffer (halves VMEM
            # spent on weights at large C; important on v7x's 64 MiB VMEM).
            const_kwargs = dict(pipeline_mode=pl.Buffered(1))
        if split:
            w_spec = pl.BlockSpec((4, C, C), lambda b, l: (0, 0, 0), **const_kwargs)
        else:
            w_spec = pl.BlockSpec((3 * C, 2 * C), lambda b, l: (0, 0), **const_kwargs)
        b_spec = pl.BlockSpec((1, 2 * C), lambda b, l: (0, 0), **const_kwargs)

        return pl.pallas_call(
            functools.partial(_upsample1d_kernel, split=split),
            out_shape=jax.ShapeDtypeStruct((B, Lp, 2 * C), out_dtype),
            grid_spec=pltpu.PrefetchScalarGridSpec(
                num_scalar_prefetch=0,
                grid=(B, nL),
                in_specs=[
                    pl.BlockSpec((1, TL, C), lambda b, l: (b, l, 0)),
                    pl.BlockSpec((1, 1, 2, C), lambda b, l: (b, l, 0, 0)),
                    w_spec,
                    b_spec,
                ],
                out_specs=pl.BlockSpec((1, TL, 2 * C), lambda b, l: (b, l, 0)),
            ),
            compiler_params=pltpu.CompilerParams(
                dimension_semantics=("parallel", "parallel"),
                vmem_limit_bytes=vmem_limit,
            ),
        )(x_blc, halo, w_packed, b_packed)

    if _SINGLE_BUFFER_WEIGHTS:
        try:
            out = run(True)
        except Exception:
            _SINGLE_BUFFER_WEIGHTS = False
            out = run(False)
    else:
        out = run(False)

    if Lp != L:
        out = out[:, :L]
    # (B, L, 2C) -> (B, L, 2, C) -> (B, 2L, C): contiguous reshape interleaving
    # even/odd output phases.
    return out.reshape(B, L, 2, C).reshape(B, 2 * L, C)


def upsample1d(x_ncw, weight, bias, *, compute_dtype=None, out_dtype=None,
               max_rows_per_tile=None):
    """PyTorch-compatible NCW interface: x (B, C, L) -> (B, C, 2L).

    Note: the two transposes are extra HBM passes; prefer upsample1d_blc if the
    surrounding model can stay channels-last.
    """
    x_blc = jnp.transpose(x_ncw, (0, 2, 1))                     # (B, L, C)
    out_blc = upsample1d_blc(x_blc, weight, bias, compute_dtype=compute_dtype,
                             out_dtype=out_dtype, max_rows_per_tile=max_rows_per_tile)
    return jnp.transpose(out_blc, (0, 2, 1))                    # (B, C, 2L)


def _reference_convtranspose1d(x, w, b):
    """Plain numpy reference: PyTorch ConvTranspose1d(C, C, 4, stride=2, pad=1)."""
    B, C, L = x.shape
    K, stride, pad = 4, 2, 1
    Lout = (L - 1) * stride - 2 * pad + K
    out = np.tile(b.reshape(1, C, 1), (B, 1, Lout)).astype(np.float64)
    for bidx in range(B):
        for l in range(L):
            for k in range(K):
                t = l * stride - pad + k
                if 0 <= t < Lout:
                    out[bidx, :, t] += x[bidx, :, l] @ w[:, :, k]   # w: (C_in, C_out, K)
    return out


if __name__ == "__main__":
    def _check(B, C, L, compute_dtype=None, max_rows_per_tile=None,
               rtol=1e-5, atol=1e-5):
        key = jax.random.PRNGKey(0)
        kx, kw, kb = jax.random.split(key, 3)
        bound = 1.0 / np.sqrt(C * 4)
        weight = jax.random.uniform(kw, (C, C, 4), jnp.float32, -bound, bound)
        bias = jax.random.uniform(kb, (C,), jnp.float32, -bound, bound)
        x = jax.random.normal(kx, (B, C, L), jnp.float32)

        y = upsample1d(x, weight, bias, compute_dtype=compute_dtype,
                       max_rows_per_tile=max_rows_per_tile)
        y = jax.block_until_ready(y)
        assert y.shape == (B, C, 2 * L), y.shape

        ref = _reference_convtranspose1d(np.asarray(x), np.asarray(weight),
                                         np.asarray(bias))
        np.testing.assert_allclose(np.asarray(y, dtype=np.float64), ref,
                                   rtol=rtol, atol=atol)

    # Demo shape (dim=4, B=2, L=16): fused path, single L tile.
    _check(2, 4, 16)
    # Same shape with forced TL=8: exercises L tiling + halo rows.
    _check(2, 4, 16, max_rows_per_tile=8)
    # C=128, L=20, TL=8: zero-free split MXU path + L padding + halos.
    _check(2, 128, 20, max_rows_per_tile=8, rtol=5e-5, atol=5e-5)
    # bf16 compute (halved read bytes), f32 accumulation/output; loose tolerance.
    _check(2, 4, 16, compute_dtype=jnp.bfloat16, rtol=3e-2, atol=3e-2)

    print("KERNEL_OK")
</pallas_src>

<mosaic_0001>
module attributes {stable_mosaic.version = 11 : i64} {
  func.func @_upsample1d_kernel(%arg0: i32, %arg1: i32, %arg2: memref<1x16x4xf32, #tpu.memory_space<vmem>>, %arg3: memref<1x1x2x4xf32, #tpu.memory_space<vmem>>, %arg4: memref<12x8xf32, #tpu.memory_space<vmem>>, %arg5: memref<1x8xf32, #tpu.memory_space<vmem>>, %arg6: memref<1x16x8xf32, #tpu.memory_space<vmem>>) attributes {dimension_semantics = [#tpu.dimension_semantics<parallel>, #tpu.dimension_semantics<parallel>], iteration_bounds = array<i64: 2, 1>, scalar_prefetch = 0 : i64, scratch_operands = 0 : i64, tpu.core_type = #tpu.core_type<tc>, window_params = [{transform_indices = @transform_0, window_bounds = array<i64: 1, 16, 4>}, {transform_indices = @transform_1, window_bounds = array<i64: 1, 1, 2, 4>}, {pipeline_mode = #tpu.pipeline_mode<synchronous>, transform_indices = @transform_2, window_bounds = array<i64: 12, 8>}, {pipeline_mode = #tpu.pipeline_mode<synchronous>, transform_indices = @transform_3, window_bounds = array<i64: 1, 8>}, {transform_indices = @transform_4, window_bounds = array<i64: 1, 16, 8>}]} {
    %c0 = arith.constant 0 : index
    %c0_0 = arith.constant 0 : index
    %c0_1 = arith.constant 0 : index
    %0 = vector.load %arg2[%c0, %c0_0, %c0_1] : memref<1x16x4xf32, #tpu.memory_space<vmem>>, vector<1x16x4xf32>
    %1 = vector.shape_cast %0 : vector<1x16x4xf32> to vector<16x4xf32>
    %c0_2 = arith.constant 0 : index
    %c0_3 = arith.constant 0 : index
    %c0_4 = arith.constant 0 : index
    %c0_5 = arith.constant 0 : index
    %2 = vector.load %arg3[%c0_2, %c0_3, %c0_4, %c0_5] : memref<1x1x2x4xf32, #tpu.memory_space<vmem>>, vector<1x1x2x4xf32>
    %3 = vector.shape_cast %2 : vector<1x1x2x4xf32> to vector<2x4xf32>
    %4 = vector.extract_strided_slice %3 {offsets = [0, 0], sizes = [1, 4], strides = [1, 1]} : vector<2x4xf32> to vector<1x4xf32>
    %5 = vector.extract_strided_slice %3 {offsets = [1, 0], sizes = [1, 4], strides = [1, 1]} : vector<2x4xf32> to vector<1x4xf32>
    %6 = tpu.iota {dimensions = array<i32: 0>} : vector<16x1xi32>
    %c0_i32 = arith.constant 0 : i32
    %7 = vector.broadcast %c0_i32 : i32 to vector<16x1xi32>
    %8 = arith.cmpi eq, %6, %7 : vector<16x1xi32>
    %c1_i32 = arith.constant 1 : i32
    %9 = tpu.dynamic_rotate %1 by %c1_i32 dim 0 : vector<16x4xf32>, i32 -> vector<16x4xf32>
    %10 = vector.shape_cast %8 : vector<16x1xi1> to vector<16x1xi1>
    %11 = vector.broadcast %10 : vector<16x1xi1> to vector<16x4xi1>
    %12 = vector.shape_cast %4 : vector<1x4xf32> to vector<1x4xf32>
    %13 = vector.broadcast %12 : vector<1x4xf32> to vector<16x4xf32>
    %14 = arith.select %11, %13, %9 : vector<16x4xi1>, vector<16x4xf32>
    %c15_i32 = arith.constant 15 : i32
    %15 = vector.broadcast %c15_i32 : i32 to vector<16x1xi32>
    %16 = arith.cmpi eq, %6, %15 : vector<16x1xi32>
    %c15_i32_6 = arith.constant 15 : i32
    %17 = tpu.dynamic_rotate %1 by %c15_i32_6 dim 0 : vector<16x4xf32>, i32 -> vector<16x4xf32>
    %18 = vector.shape_cast %16 : vector<16x1xi1> to vector<16x1xi1>
    %19 = vector.broadcast %18 : vector<16x1xi1> to vector<16x4xi1>
    %20 = vector.shape_cast %5 : vector<1x4xf32> to vector<1x4xf32>
    %21 = vector.broadcast %20 : vector<1x4xf32> to vector<16x4xf32>
    %22 = arith.select %19, %21, %17 : vector<16x4xi1>, vector<16x4xf32>
    %23 = tpu.concatenate %1, %14, %22 in 1 : vector<16x4xf32>, vector<16x4xf32>, vector<16x4xf32> -> vector<16x12xf32>
    %c0_7 = arith.constant 0 : index
    %c0_8 = arith.constant 0 : index
    %24 = vector.load %arg4[%c0_7, %c0_8] : memref<12x8xf32, #tpu.memory_space<vmem>>, vector<12x8xf32>
    %cst = arith.constant dense<0.000000e+00> : vector<16x8xf32>
    %25 = tpu.matmul %23, %24, %cst {dimension_numbers = #tpu.dot_dimension_numbers<[1], [0], [0], [1], [0, 0, 1, 1], [], []>} : vector<16x12xf32>, vector<12x8xf32>, vector<16x8xf32> -> vector<16x8xf32>
    %c0_9 = arith.constant 0 : index
    %c0_10 = arith.constant 0 : index
    %26 = vector.load %arg5[%c0_9, %c0_10] : memref<1x8xf32, #tpu.memory_space<vmem>>, vector<1x8xf32>
    %27 = vector.broadcast %26 : vector<1x8xf32> to vector<16x8xf32>
    %28 = arith.addf %25, %27 : vector<16x8xf32>
    %c0_11 = arith.constant 0 : index
    %c0_12 = arith.constant 0 : index
    %c0_13 = arith.constant 0 : index
    %29 = vector.load %arg6[%c0_11, %c0_12, %c0_13] : memref<1x16x8xf32, #tpu.memory_space<vmem>>, vector<1x16x8xf32>
    %30 = vector.shape_cast %29 : vector<1x16x8xf32> to vector<16x8xf32>
    %31 = vector.shape_cast %28 : vector<16x8xf32> to vector<1x16x8xf32>
    tpu.vector_store %arg6[%c0_11, %c0_12, %c0_13], %31 {strides = array<i32>} : memref<1x16x8xf32, #tpu.memory_space<vmem>>, vector<1x16x8xf32>,
    return
  }
  func.func @transform_0(%arg0: i32, %arg1: i32) -> (i32, i32, i32) {
    %c0_i32 = arith.constant 0 : i32
    %c0_i32_0 = arith.constant 0 : i32
    return %arg0, %arg1, %c0_i32 : i32, i32, i32
  }
  func.func @transform_1(%arg0: i32, %arg1: i32) -> (i32, i32, i32, i32) {
    %c0_i32 = arith.constant 0 : i32
    %c0_i32_0 = arith.constant 0 : i32
    %c0_i32_1 = arith.constant 0 : i32
    return %arg0, %arg1, %c0_i32, %c0_i32_0 : i32, i32, i32, i32
  }
  func.func @transform_2(%arg0: i32, %arg1: i32) -> (i32, i32) {
    %c0_i32 = arith.constant 0 : i32
    %c0_i32_0 = arith.constant 0 : i32
    %c0_i32_1 = arith.constant 0 : i32
    return %c0_i32, %c0_i32_0 : i32, i32
  }
  func.func @transform_3(%arg0: i32, %arg1: i32) -> (i32, i32) {
    %c0_i32 = arith.constant 0 : i32
    %c0_i32_0 = arith.constant 0 : i32
    %c0_i32_1 = arith.constant 0 : i32
    return %c0_i32, %c0_i32_0 : i32, i32
  }
  func.func @transform_4(%arg0: i32, %arg1: i32) -> (i32, i32, i32) {
    %c0_i32 = arith.constant 0 : i32
    %c0_i32_0 = arith.constant 0 : i32
    return %arg0, %arg1, %c0_i32 : i32, i32, i32
  }
}

module attributes {stable_mosaic.version = 11 : i64} {
  func.func @_upsample1d_kernel(%arg0: i32, %arg1: i32, %arg2: memref<1x16x4xf32, #tpu.memory_space<vmem>>, %arg3: memref<1x1x2x4xf32, #tpu.memory_space<vmem>>, %arg4: memref<12x8xf32, #tpu.memory_space<vmem>>, %arg5: memref<1x8xf32, #tpu.memory_space<vmem>>, %arg6: memref<1x16x8xf32, #tpu.memory_space<vmem>>) attributes {dimension_semantics = [#tpu.dimension_semantics<parallel>, #tpu.dimension_semantics<parallel>], iteration_bounds = array<i64: 2, 1>, scalar_prefetch = 0 : i64, scratch_operands = 0 : i64, tpu.core_type = #tpu.core_type<tc>, window_params = [{transform_indices = @transform_0, window_bounds = array<i64: 1, 16, 4>}, {transform_indices = @transform_1, window_bounds = array<i64: 1, 1, 2, 4>}, {pipeline_mode = #tpu.pipeline_mode<synchronous>, transform_indices = @transform_2, window_bounds = array<i64: 12, 8>}, {pipeline_mode = #tpu.pipeline_mode<synchronous>, transform_indices = @transform_3, window_bounds = array<i64: 1, 8>}, {transform_indices = @transform_4, window_bounds = array<i64: 1, 16, 8>}]} {
    %c0 = arith.constant 0 : index
    %c0_0 = arith.constant 0 : index
    %c0_1 = arith.constant 0 : index
    %0 = vector.load %arg2[%c0, %c0_0, %c0_1] : memref<1x16x4xf32, #tpu.memory_space<vmem>>, vector<1x16x4xf32>
    %1 = vector.shape_cast %0 : vector<1x16x4xf32> to vector<16x4xf32>
    %c0_2 = arith.constant 0 : index
    %c0_3 = arith.constant 0 : index
    %c0_4 = arith.constant 0 : index
    %c0_5 = arith.constant 0 : index
    %2 = vector.load %arg3[%c0_2, %c0_3, %c0_4, %c0_5] : memref<1x1x2x4xf32, #tpu.memory_space<vmem>>, vector<1x1x2x4xf32>
    %3 = vector.shape_cast %2 : vector<1x1x2x4xf32> to vector<2x4xf32>
    %4 = vector.extract_strided_slice %3 {offsets = [0, 0], sizes = [1, 4], strides = [1, 1]} : vector<2x4xf32> to vector<1x4xf32>
    %5 = vector.extract_strided_slice %3 {offsets = [1, 0], sizes = [1, 4], strides = [1, 1]} : vector<2x4xf32> to vector<1x4xf32>
    %6 = tpu.iota {dimensions = array<i32: 0>} : vector<16x1xi32>
    %c0_i32 = arith.constant 0 : i32
    %7 = vector.broadcast %c0_i32 : i32 to vector<16x1xi32>
    %8 = arith.cmpi eq, %6, %7 : vector<16x1xi32>
    %c1_i32 = arith.constant 1 : i32
    %9 = tpu.dynamic_rotate %1 by %c1_i32 dim 0 : vector<16x4xf32>, i32 -> vector<16x4xf32>
    %10 = vector.shape_cast %8 : vector<16x1xi1> to vector<16x1xi1>
    %11 = vector.broadcast %10 : vector<16x1xi1> to vector<16x4xi1>
    %12 = vector.shape_cast %4 : vector<1x4xf32> to vector<1x4xf32>
    %13 = vector.broadcast %12 : vector<1x4xf32> to vector<16x4xf32>
    %14 = arith.select %11, %13, %9 : vector<16x4xi1>, vector<16x4xf32>
    %c15_i32 = arith.constant 15 : i32
    %15 = vector.broadcast %c15_i32 : i32 to vector<16x1xi32>
    %16 = arith.cmpi eq, %6, %15 : vector<16x1xi32>
    %c15_i32_6 = arith.constant 15 : i32
    %17 = tpu.dynamic_rotate %1 by %c15_i32_6 dim 0 : vector<16x4xf32>, i32 -> vector<16x4xf32>
    %18 = vector.shape_cast %16 : vector<16x1xi1> to vector<16x1xi1>
    %19 = vector.broadcast %18 : vector<16x1xi1> to vector<16x4xi1>
    %20 = vector.shape_cast %5 : vector<1x4xf32> to vector<1x4xf32>
    %21 = vector.broadcast %20 : vector<1x4xf32> to vector<16x4xf32>
    %22 = arith.select %19, %21, %17 : vector<16x4xi1>, vector<16x4xf32>
    %23 = tpu.concatenate %1, %14, %22 in 1 : vector<16x4xf32>, vector<16x4xf32>, vector<16x4xf32> -> vector<16x12xf32>
    %c0_7 = arith.constant 0 : index
    %c0_8 = arith.constant 0 : index
    %24 = vector.load %arg4[%c0_7, %c0_8] : memref<12x8xf32, #tpu.memory_space<vmem>>, vector<12x8xf32>
    %cst = arith.constant dense<0.000000e+00> : vector<16x8xf32>
    %25 = tpu.matmul %23, %24, %cst {dimension_numbers = #tpu.dot_dimension_numbers<[1], [0], [0], [1], [0, 0, 1, 1], [], []>} : vector<16x12xf32>, vector<12x8xf32>, vector<16x8xf32> -> vector<16x8xf32>
    %c0_9 = arith.constant 0 : index
    %c0_10 = arith.constant 0 : index
    %26 = vector.load %arg5[%c0_9, %c0_10] : memref<1x8xf32, #tpu.memory_space<vmem>>, vector<1x8xf32>
    %27 = vector.broadcast %26 : vector<1x8xf32> to vector<16x8xf32>
    %28 = arith.addf %25, %27 : vector<16x8xf32>
    %c0_11 = arith.constant 0 : index
    %c0_12 = arith.constant 0 : index
    %c0_13 = arith.constant 0 : index
    %29 = vector.load %arg6[%c0_11, %c0_12, %c0_13] : memref<1x16x8xf32, #tpu.memory_space<vmem>>, vector<1x16x8xf32>
    %30 = vector.shape_cast %29 : vector<1x16x8xf32> to vector<16x8xf32>
    %31 = vector.shape_cast %28 : vector<16x8xf32> to vector<1x16x8xf32>
    tpu.vector_store %arg6[%c0_11, %c0_12, %c0_13], %31 {strides = array<i32>} : memref<1x16x8xf32, #tpu.memory_space<vmem>>, vector<1x16x8xf32>,
    return
  }
  func.func @transform_0(%arg0: i32, %arg1: i32) -> (i32, i32, i32) {
    %c0_i32 = arith.constant 0 : i32
    %c0_i32_0 = arith.constant 0 : i32
    return %arg0, %arg1, %c0_i32 : i32, i32, i32
  }
  func.func @transform_1(%arg0: i32, %arg1: i32) -> (i32, i32, i32, i32) {
    %c0_i32 = arith.constant 0 : i32
    %c0_i32_0 = arith.constant 0 : i32
    %c0_i32_1 = arith.constant 0 : i32
    return %arg0, %arg1, %c0_i32, %c0_i32_0 : i32, i32, i32, i32
  }
  func.func @transform_2(%arg0: i32, %arg1: i32) -> (i32, i32) {
    %c0_i32 = arith.constant 0 : i32
    %c0_i32_0 = arith.constant 0 : i32
    %c0_i32_1 = arith.constant 0 : i32
    return %c0_i32, %c0_i32_0 : i32, i32
  }
  func.func @transform_3(%arg0: i32, %arg1: i32) -> (i32, i32) {
    %c0_i32 = arith.constant 0 : i32
    %c0_i32_0 = arith.constant 0 : i32
    %c0_i32_1 = arith.constant 0 : i32
    return %c0_i32, %c0_i32_0 : i32, i32
  }
  func.func @transform_4(%arg0: i32, %arg1: i32) -> (i32, i32, i32) {
    %c0_i32 = arith.constant 0 : i32
    %c0_i32_0 = arith.constant 0 : i32
    return %arg0, %arg1, %c0_i32 : i32, i32, i32
  }
}

</mosaic_0001>

<bundles_post_ra>
// kernel: tpu_custom_call.1
= control target key start
LH: loop header
LB: loop body
LE: loop exit
PB: predicated region body
PF: predicated region fallthrough
CT: control target
= control target key end

     0   :  { %s640_s15 = smov 0   ;;  %s642_s16 = smov 0   ;;  %s700_s0 = inlined_call_operand.vmem [shape: f32[2,16,4], index: 0, kind: input, shape index: {}]   ;;  %s701_s1 = inlined_call_operand.vmem [shape: f32[2,1,2,4], index: 1, kind: input, shape index: {}]   ;;  %s702_s2 = inlined_call_operand.vmem [shape: f32[12,8], index: 2, kind: input, shape index: {}]   ;;  %s703_s3 = inlined_call_operand.vmem [shape: f32[1,8], index: 3, kind: input, shape index: {}]   ;;  %s704_s4 = inlined_call_operand.vmem [shape: f32[2,16,8], index: 4, kind: output, shape index: {}]  }
   0x1   :  { %s644_s17 = smov 0  }
   0x2 LB: > { %s26_s18 = sadd.s32 1, %s606_s16  ;;  %p530_p0 = scmp.ge.s32.totalorder %s610_s17, 1  ;;  %s610_s17 = sphi %s644_s17, %s14_s17   ;;  %s606_s16 = sphi %s642_s16, %s706_s16   ;;  %s602_s15 = sphi %s640_s15, %s705_s15  }
   0x3   : > { %p28_p1 = scmp.ge.s32.totalorder %s26_s18, 2  ;;  %p197_p2 = scmp.lt.s32.totalorder %s610_s17, 3 }
   0x5   : > { %s708_s18 = smov (%p28_p1, %s26_s18), 0  ;;  %p198_p3 = pnand %p530_p0, %p197_p2 }
   0x6   : > { %p239_p4 = scmp.lt.s32.totalorder (!%p198_p3), %s602_s15, 1  ;;  %v268_v0 = vlaneseq (!%p198_p3)  ;;  %v327_v1 = vld [vmem:[%s702_s2] sm:$0xff] (!%p198_p3)  ;;  %v328_v2 = vld [vmem:[%s702_s2 + $0x8] sm:$0xf] (!%p198_p3)  ;;  %vm343_vm0 = vcmask (!%p198_p3), 1043456   ;;  %vm612_vm1 = vmmov (!%p198_p3), 1  }
   0x7   : > { %201 = sbr.rel (%p198_p3) target bundleno = 359 (0x167), region = 36  ;;  %v555_v3 = vpack.c.bf16 (!%p198_p3), %v328_v2, %v327_v1  ;;  %vm556_vm2 = vmpackc.low (!%p198_p3), %vm343_vm0, %vm612_vm1  ;;  %s613_s5 = smov (!%p198_p3), 4   ;;  %vm321_vm7 = vcmask (!%p198_p3), 31744   ;;  %vm324_vm8 = vcmask (!%p198_p3), 64512   ;;  %vm336_vm9 = vcmask (!%p198_p3), 97280  }
   0x8   : > { %v269_v4 = vshrl.u32 (!%p198_p3), %v268_v0, 7  ;;  %s614_s6 = smov (!%p198_p3), 8   ;;  %v536_v31 = vld [vmem:[%s703_s3] ss:$0 sm:$0xff] (!%p198_p3) }
   0x9   : > { %557 = vmatprep.subr.msk.bf16.mxu0 (!%p198_p3), %vm556_vm2, %v555_v3 }
   0xa   : > { %v284_v5 = vsub.s32 (!%p198_p3), 0, %v269_v4  ;;  %560 = vmatpush3.bf16.msk.msra.mxu0 (!%p198_p3), %vm556_vm2, %v555_v3  ;;  %vm271_vm3 = vcmp.eq.s32.totalorder (!%p198_p3), %v269_v4, 0  ;;  %v270_v6 = vadd.s32 (!%p198_p3), 8, %v269_v4  ;;  %v301_v7 = vsub.s32 (!%p198_p3), 1, %v269_v4 }
   0xb   : > { %vm275_vm4 = vcmp.lt.s32.totalorder (!%p198_p3), %v269_v4, 1  ;;  %vm292_vm5 = vcmp.lt.s32.totalorder (!%p198_p3), %v269_v4, 7 }
   0xc   : > { %vm289_vm6 = vcmp.eq.s32.totalorder (!%p198_p3), %v270_v6, 15 }
   0xe   : > { %s710_s15 = smov (!%p239_p4, %s602_s15), 1 }
   0xf   : > { %s542_s23 = sshll.u32 %s710_s15, 4  ;;  %s533_s24 = sshll.u32 %s710_s15, 1 }
  0x10   : > { %s246_s27 = scalar_lea.vmem %s700_s0, %s542_s23  ;;  %s254_s30 = scalar_lea.vmem %s701_s1, %s533_s24 }
  0x11   : > { %v265_v8 = vld [vmem:[%s246_s27] sm:$0xff]  ;;  %v266_v9 = vld [vmem:[%s246_s27 + $0x8] sm:$0xff]  ;;  %s263_s11 = scalar_lea.vmem %s704_s4, %s542_s23 }
  0x12   : > { %v267_v10 = vld [vmem:[%s254_s30] sm:$0x3]  ;;  %v273_v11 = vrot.slane %v265_v8, 7  ;;  %v274_v12 = vrot.slane %v266_v9, 7  ;;  %v290_v14 = vrot.slane %v265_v8, 1  ;;  %v291_v15 = vrot.slane %v266_v9, 1 }
  0x13   : > { %v285_v13 = vrot.slane %v267_v10, %v284_v5  ;;  %v302_v16 = vrot.slane %v267_v10, %v301_v7 }
  0x14   : > { %v277_v17 = vsel %vm275_vm4, %v274_v12, %v273_v11  ;;  %v293_v19 = vsel %vm292_vm5, %v290_v14, %v291_v15  ;;  %v294_v20 = vsel %vm292_vm5, %v291_v15, %v290_v14  ;;  %v276_v21 = vsel %vm275_vm4, %v273_v11, %v274_v12 }
  0x15   : > { %v286_v18 = vsel %vm271_vm3, %v285_v13, %v277_v17  ;;  %315 = vrot.lane.b32.xlu1 %v293_v19, %s614_s6  ;;  %v304_v22 = vsel %vm289_vm6, %v302_v16, %v294_v20 }
  0x16   : > { %307 = vrot.lane.b32.xlu0 %v286_v18, %s613_s5 }
  0x19   : > { %317 = vrot.lane.b32.xlu1 %v304_v22, %s614_s6 }
  0x1a   : > { %309 = vrot.lane.b32.xlu0 %v276_v21, %s613_s5 }
  0x87   : > { %v316_v24 = vpop.permute.xlu1 %315 }
  0x88   : > { %v308_v23 = vpop.permute.xlu0 %307 }
  0x89   : > { %v322_v25 = vsel %vm321_vm7, %v265_v8, %v308_v23 }
  0x8a   : > { %v325_v26 = vsel %vm324_vm8, %v322_v25, %v316_v24 }
  0x8b   : > { %552 = vmatprep.mubr.msk.f32.mxu0 %vm336_vm9, %v325_v26  ;;  %v318_v28 = vpop.permute.xlu1 %317 }
  0x8c   : > { %v310_v27 = vpop.permute.xlu0 %309 }
  0x8d   : > { %v323_v29 = vsel %vm321_vm7, %v266_v9, %v310_v27 }
  0x8e   : > { %v326_v30 = vsel %vm324_vm8, %v323_v29, %v318_v28 }
  0x8f   : > { %553 = vmatmul.mubr.msk.f32.vlgmr.msra.gmra.mrb[0].mxu0 %vm336_vm9, %v326_v30 }
 0x162   : > { %v554_v32 = vpop.f32.mrb[0].mxu0 }
 0x163   : > { %v419_v33 = vadd.f32 %v554_v32, %v536_v31  ;;  %v413_v34 = vpop.f32.mrb[1].mxu0 }
 0x164   : > { %v414_v35 = vadd.f32 %v536_v31, %v413_v34 }
 0x165   : > { %423 = vst.msk [vmem:[%s263_s11 + $0x8] sm:$0xff] %vm324_vm8, %v419_v33 }
 0x166   : > { %422 = vst.msk [vmem:[%s263_s11] sm:$0xff] %vm324_vm8, %v414_v35 }
 0x167 PF: > { %s14_s17 = sadd.s32 1, %s610_s17   ;;  %s705_s15 = smov %s606_s16 }
 0x168   : > { %p11_p5 = scmp.ge.s32.totalorder %s14_s17, 4   ;;  %s706_s16 = smov %s708_s18 }
 0x16a   :  { %13 = sbr.rel (!%p11_p5) target bundleno = 2 (0x2), region = 69 }

// kernel: tpu_custom_call.1
= control target key start
LH: loop header
LB: loop body
LE: loop exit
PB: predicated region body
PF: predicated region fallthrough
CT: control target
= control target key end

     0   :  { %s640_s15 = smov 0   ;;  %s642_s16 = smov 0   ;;  %s700_s0 = inlined_call_operand.vmem [shape: f32[2,16,4], index: 0, kind: input, shape index: {}]   ;;  %s701_s1 = inlined_call_operand.vmem [shape: f32[2,1,2,4], index: 1, kind: input, shape index: {}]   ;;  %s702_s2 = inlined_call_operand.vmem [shape: f32[12,8], index: 2, kind: input, shape index: {}]   ;;  %s703_s3 = inlined_call_operand.vmem [shape: f32[1,8], index: 3, kind: input, shape index: {}]   ;;  %s704_s4 = inlined_call_operand.vmem [shape: f32[2,16,8], index: 4, kind: output, shape index: {}]  }
   0x1   :  { %s644_s17 = smov 0  }
   0x2 LB: > { %s26_s18 = sadd.s32 1, %s606_s16  ;;  %p530_p0 = scmp.ge.s32.totalorder %s610_s17, 1  ;;  %s610_s17 = sphi %s644_s17, %s14_s17   ;;  %s606_s16 = sphi %s642_s16, %s706_s16   ;;  %s602_s15 = sphi %s640_s15, %s705_s15  }
   0x3   : > { %p28_p1 = scmp.ge.s32.totalorder %s26_s18, 2  ;;  %p197_p2 = scmp.lt.s32.totalorder %s610_s17, 3 }
   0x5   : > { %s708_s18 = smov (%p28_p1, %s26_s18), 0  ;;  %p198_p3 = pnand %p530_p0, %p197_p2 }
   0x6   : > { %p239_p4 = scmp.lt.s32.totalorder (!%p198_p3), %s602_s15, 1  ;;  %v268_v0 = vlaneseq (!%p198_p3)  ;;  %v327_v1 = vld [vmem:[%s702_s2] sm:$0xff] (!%p198_p3)  ;;  %v328_v2 = vld [vmem:[%s702_s2 + $0x8] sm:$0xf] (!%p198_p3)  ;;  %vm343_vm0 = vcmask (!%p198_p3), 1043456   ;;  %vm612_vm1 = vmmov (!%p198_p3), 1  }
   0x7   : > { %201 = sbr.rel (%p198_p3) target bundleno = 359 (0x167), region = 36  ;;  %v555_v3 = vpack.c.bf16 (!%p198_p3), %v328_v2, %v327_v1  ;;  %vm556_vm2 = vmpackc.low (!%p198_p3), %vm343_vm0, %vm612_vm1  ;;  %s613_s5 = smov (!%p198_p3), 4   ;;  %vm321_vm7 = vcmask (!%p198_p3), 31744   ;;  %vm324_vm8 = vcmask (!%p198_p3), 64512   ;;  %vm336_vm9 = vcmask (!%p198_p3), 97280  }
   0x8   : > { %v269_v4 = vshrl.u32 (!%p198_p3), %v268_v0, 7  ;;  %s614_s6 = smov (!%p198_p3), 8   ;;  %v536_v31 = vld [vmem:[%s703_s3] ss:$0 sm:$0xff] (!%p198_p3) }
   0x9   : > { %557 = vmatprep.subr.msk.bf16.mxu0 (!%p198_p3), %vm556_vm2, %v555_v3 }
   0xa   : > { %v284_v5 = vsub.s32 (!%p198_p3), 0, %v269_v4  ;;  %560 = vmatpush3.bf16.msk.msra.mxu0 (!%p198_p3), %vm556_vm2, %v555_v3  ;;  %vm271_vm3 = vcmp.eq.s32.totalorder (!%p198_p3), %v269_v4, 0  ;;  %v270_v6 = vadd.s32 (!%p198_p3), 8, %v269_v4  ;;  %v301_v7 = vsub.s32 (!%p198_p3), 1, %v269_v4 }
   0xb   : > { %vm275_vm4 = vcmp.lt.s32.totalorder (!%p198_p3), %v269_v4, 1  ;;  %vm292_vm5 = vcmp.lt.s32.totalorder (!%p198_p3), %v269_v4, 7 }
   0xc   : > { %vm289_vm6 = vcmp.eq.s32.totalorder (!%p198_p3), %v270_v6, 15 }
   0xe   : > { %s710_s15 = smov (!%p239_p4, %s602_s15), 1 }
   0xf   : > { %s542_s23 = sshll.u32 %s710_s15, 4  ;;  %s533_s24 = sshll.u32 %s710_s15, 1 }
  0x10   : > { %s246_s27 = scalar_lea.vmem %s700_s0, %s542_s23  ;;  %s254_s30 = scalar_lea.vmem %s701_s1, %s533_s24 }
  0x11   : > { %v265_v8 = vld [vmem:[%s246_s27] sm:$0xff]  ;;  %v266_v9 = vld [vmem:[%s246_s27 + $0x8] sm:$0xff]  ;;  %s263_s11 = scalar_lea.vmem %s704_s4, %s542_s23 }
  0x12   : > { %v267_v10 = vld [vmem:[%s254_s30] sm:$0x3]  ;;  %v273_v11 = vrot.slane %v265_v8, 7  ;;  %v274_v12 = vrot.slane %v266_v9, 7  ;;  %v290_v14 = vrot.slane %v265_v8, 1  ;;  %v291_v15 = vrot.slane %v266_v9, 1 }
  0x13   : > { %v285_v13 = vrot.slane %v267_v10, %v284_v5  ;;  %v302_v16 = vrot.slane %v267_v10, %v301_v7 }
  0x14   : > { %v277_v17 = vsel %vm275_vm4, %v274_v12, %v273_v11  ;;  %v293_v19 = vsel %vm292_vm5, %v290_v14, %v291_v15  ;;  %v294_v20 = vsel %vm292_vm5, %v291_v15, %v290_v14  ;;  %v276_v21 = vsel %vm275_vm4, %v273_v11, %v274_v12 }
  0x15   : > { %v286_v18 = vsel %vm271_vm3, %v285_v13, %v277_v17  ;;  %315 = vrot.lane.b32.xlu1 %v293_v19, %s614_s6  ;;  %v304_v22 = vsel %vm289_vm6, %v302_v16, %v294_v20 }
  0x16   : > { %307 = vrot.lane.b32.xlu0 %v286_v18, %s613_s5 }
  0x19   : > { %317 = vrot.lane.b32.xlu1 %v304_v22, %s614_s6 }
  0x1a   : > { %309 = vrot.lane.b32.xlu0 %v276_v21, %s613_s5 }
  0x87   : > { %v316_v24 = vpop.permute.xlu1 %315 }
  0x88   : > { %v308_v23 = vpop.permute.xlu0 %307 }
  0x89   : > { %v322_v25 = vsel %vm321_vm7, %v265_v8, %v308_v23 }
  0x8a   : > { %v325_v26 = vsel %vm324_vm8, %v322_v25, %v316_v24 }
  0x8b   : > { %552 = vmatprep.mubr.msk.f32.mxu0 %vm336_vm9, %v325_v26  ;;  %v318_v28 = vpop.permute.xlu1 %317 }
  0x8c   : > { %v310_v27 = vpop.permute.xlu0 %309 }
  0x8d   : > { %v323_v29 = vsel %vm321_vm7, %v266_v9, %v310_v27 }
  0x8e   : > { %v326_v30 = vsel %vm324_vm8, %v323_v29, %v318_v28 }
  0x8f   : > { %553 = vmatmul.mubr.msk.f32.vlgmr.msra.gmra.mrb[0].mxu0 %vm336_vm9, %v326_v30 }
 0x162   : > { %v554_v32 = vpop.f32.mrb[0].mxu0 }
 0x163   : > { %v419_v33 = vadd.f32 %v554_v32, %v536_v31  ;;  %v413_v34 = vpop.f32.mrb[1].mxu0 }
 0x164   : > { %v414_v35 = vadd.f32 %v536_v31, %v413_v34 }
 0x165   : > { %423 = vst.msk [vmem:[%s263_s11 + $0x8] sm:$0xff] %vm324_vm8, %v419_v33 }
 0x166   : > { %422 = vst.msk [vmem:[%s263_s11] sm:$0xff] %vm324_vm8, %v414_v35 }
 0x167 PF: > { %s14_s17 = sadd.s32 1, %s610_s17   ;;  %s705_s15 = smov %s606_s16 }
 0x168   : > { %p11_p5 = scmp.ge.s32.totalorder %s14_s17, 4   ;;  %s706_s16 = smov %s708_s18 }
 0x16a   :  { %13 = sbr.rel (!%p11_p5) target bundleno = 2 (0x2), region = 69 }

</bundles_post_ra>
